<compile_context>
chip_gen: v6e
topology: v6e:2x2x1
jax: 0.10.0
libtpu: 0.0.40
codegen_flags: <defaults>
</compile_context>

<pallas_src>
import functools

import jax
import jax.numpy as jnp
from jax.experimental import pallas as pl
from jax.experimental.pallas import tpu as pltpu

_LANE = 128


def _round_down(v, m):
    return (v // m) * m


def _round_up(v, m):
    return ((v + m - 1) // m) * m


def _tpu_vmem_capacity_bytes(default=64 << 20):
    """Per-core VMEM capacity; conservative (v7x-sized) fallback if unknown."""
    try:
        info = pltpu.get_tpu_info()
    except Exception:
        return default
    for name in ("vmem_capacity_bytes", "vmem_size_bytes", "vmem_bytes"):
        cap = getattr(info, name, None)
        if cap:
            return int(cap)
    return default


def _x_block_spec(block_shape, index_map, depth):
    """BlockSpec with optional deeper multi-buffering (graceful fallback)."""
    if depth <= 2:
        return pl.BlockSpec(block_shape, index_map)
    try:
        return pl.BlockSpec(block_shape, index_map, pipeline_mode=pl.Buffered(depth))
    except (TypeError, AttributeError):
        return pl.BlockSpec(block_shape, index_map)


def _pooled_sum_kernel(x_ref, o_ref, *, total_spatial, tile_spatial,
                       chunks_per_group, mask_needed):
    """Streaming spatial sum.  x block: (BC, ts); o block: (1, BC, 1)."""
    p = pl.program_id(0)
    s = pl.program_id(1)

    @pl.when(s == 0)
    def _():
        o_ref[...] = jnp.zeros_like(o_ref)

    def accumulate(chunk_f32):
        o_ref[...] += jnp.sum(chunk_f32, axis=-1, keepdims=True)[None]

    if not mask_needed:
        accumulate(x_ref[...].astype(jnp.float32))
    else:
        gidx = p * chunks_per_group + s                    # global chunk index
        crosses_end = (gidx + 1) * tile_spatial > total_spatial

        @pl.when(jnp.logical_not(crosses_end))
        def _():
            accumulate(x_ref[...].astype(jnp.float32))

        @pl.when(crosses_end)
        def _():
            chunk = x_ref[...].astype(jnp.float32)
            lane = (jax.lax.broadcasted_iota(jnp.int32, chunk.shape, 1)
                    + gidx * tile_spatial)
            # Select-before-accumulate: stale/OOB lanes (possibly NaN/Inf) are
            # zeroed before they ever touch the accumulator.
            accumulate(jnp.where(lane < total_spatial, chunk, 0.0))


def pooled_spatial_sums(x2d, *, max_block_bytes=None, vmem_limit_bytes=None):
    """x2d: (BC, S) lane-dense slab. Returns (n_par, BC, 1) f32 partial sums."""
    BC, S = x2d.shape
    itemsize = jnp.dtype(x2d.dtype).itemsize

    vmem_cap = _tpu_vmem_capacity_bytes()
    if vmem_limit_bytes is None:
        # ~48 MiB on v7x (64 MiB physical), 64 MiB on v5e/v6e (128 MiB).
        vmem_limit_bytes = min(vmem_cap * 3 // 4, 64 << 20)
    if max_block_bytes is None:
        # Leave room for 3-deep buffering of x plus headroom.
        max_block_bytes = min(16 << 20, vmem_limit_bytes // 4)

    ts_budget = max(_LANE, _round_down(max_block_bytes // (BC * itemsize), _LANE))
    # Keep each of the BC strided DMA row-segments >= ~4 KiB.
    ts_min = max(_LANE, _round_up(4096 // itemsize, _LANE))
    # TODO(synk): for very large B*C, additionally block over row groups instead
    # of only enforcing a minimum lane tile.
    ts_cap = max(ts_budget, ts_min)

    if S <= ts_cap:
        ts = S            # single block; full-extent lane dim needs no padding
    else:
        ts = ts_cap       # multiple of 128 lanes
    n_s = pl.cdiv(S, ts)
    n_par = 2 if n_s >= 4 else 1      # leading "parallel" axis (v7x: 2 TCs)
    chunks_per = pl.cdiv(n_s, n_par)
    mask_needed = (n_par * chunks_per * ts) > S

    if n_par * chunks_per == n_s:
        x_index_map = lambda p, s: (0, p * chunks_per + s)
    else:
        # Clamp trailing (fully out-of-range) chunk indices onto the last real
        # chunk; the in-kernel mask zeroes their entire contribution.
        x_index_map = lambda p, s: (0, jnp.minimum(p * chunks_per + s, n_s - 1))

    kernel = functools.partial(
        _pooled_sum_kernel, total_spatial=S, tile_spatial=ts,
        chunks_per_group=chunks_per, mask_needed=mask_needed)

    buffer_depth = 3 if chunks_per >= 3 else 2
    cost = pl.CostEstimate(
        flops=int(BC) * int(S),
        transcendentals=0,
        bytes_accessed=int(BC) * int(S) * int(itemsize) + int(n_par) * int(BC) * 4,
    )

    return pl.pallas_call(
        kernel,
        out_shape=jax.ShapeDtypeStruct((n_par, BC, 1), jnp.float32),
        grid_spec=pltpu.PrefetchScalarGridSpec(
            num_scalar_prefetch=0,
            grid=(n_par, chunks_per),
            in_specs=[_x_block_spec((BC, ts), x_index_map, buffer_depth)],
            out_specs=pl.BlockSpec((1, BC, 1), lambda p, s: (p, 0, 0)),
        ),
        compiler_params=pltpu.CompilerParams(
            dimension_semantics=("parallel", "arbitrary"),
            vmem_limit_bytes=int(vmem_limit_bytes),
        ),
        cost_estimate=cost,
    )(x2d)


def attention3d_forward(x, w1, w2, temperature, *,
                        max_block_bytes=None, vmem_limit_bytes=None):
    """x: (B, C, D, H, W); w1: (hidden, C); w2: (K, hidden). Returns (B, K) f32."""
    B, C, D, H, W = x.shape
    S = D * H * W

    # Lane-dense 2-D layout: free metadata reshape of the contiguous NCDHW array.
    # Kernel streams x in its native dtype and accumulates in f32.
    # TODO(synk): for bf16/fp8 inputs with tiny B*C, splitting each row into
    # sub-rows would fully pack 16/32-sublane vregs; skipped (HBM-bound anyway).
    x2d = x.reshape(B * C, S)
    partials = pooled_spatial_sums(
        x2d, max_block_bytes=max_block_bytes, vmem_limit_bytes=vmem_limit_bytes)

    # Combine per-core partials and run the tiny epilogue in plain JAX/XLA.
    pooled = jnp.sum(partials, axis=0)[:, 0].reshape(B, C) * (1.0 / float(S))  # (B, C)
    h = jnp.maximum(pooled @ w1.astype(jnp.float32).T, 0.0)                    # (B, hidden)
    logits = (h @ w2.astype(jnp.float32).T) * (1.0 / float(temperature))       # (B, K)
    return jax.nn.softmax(logits, axis=1)


def attention3d_reference(x, w1, w2, temperature):
    """Pure-JAX reference of the PyTorch forward (independent pooling path)."""
    pooled = jnp.mean(x.astype(jnp.float32), axis=(2, 3, 4))             # (B, C)
    h = jnp.maximum(pooled @ w1.astype(jnp.float32).T, 0.0)              # (B, hidden)
    logits = (h @ w2.astype(jnp.float32).T) / float(temperature)         # (B, K)
    return jax.nn.softmax(logits, axis=1)


if __name__ == "__main__":
    # Module config: attention3d(in_planes=4, ratios=0.25, K=4, temperature=34)
    in_planes = 4
    ratios = 0.25
    K = 4
    temperature = 34                                  # 34 % 3 == 1
    hidden_planes = int(in_planes * ratios) + 1       # in_planes != 3 -> 2

    key = jax.random.PRNGKey(0)
    kx, k1, k2, kx2 = jax.random.split(key, 4)
    # Conv3d(kernel_size=1, bias=False) weights, squeezed to 2-D matrices.
    w1 = 0.1 * jax.random.normal(k1, (hidden_planes, in_planes), dtype=jnp.float32)
    w2 = 0.1 * jax.random.normal(k2, (K, hidden_planes), dtype=jnp.float32)

    # Test 1: small volume -> single-block path (grid (1, 1), no masking).
    B, D, H, W = 2, 8, 8, 8
    x = jax.random.normal(kx, (B, in_planes, D, H, W), dtype=jnp.float32)
    out = jax.block_until_ready(attention3d_forward(x, w1, w2, temperature))
    ref = attention3d_reference(x, w1, w2, temperature)
    assert out.shape == (B, K)
    assert jnp.allclose(out, ref, atol=1e-5, rtol=1e-5), (out, ref)
    assert jnp.allclose(jnp.sum(out, axis=1), 1.0, atol=1e-5)

    # Test 2: force the 2-way-parallel, tiled, tail-masked path.  Tiny byte cap
    # -> ts = 1024 lanes; S = 4608 -> 5 real chunks, grid (2, 3): group 1 gets
    # one partial (tail-masked) chunk and one fully-OOB (clamped+masked) chunk.
    D2, H2, W2 = 18, 16, 16
    x2 = jax.random.normal(kx2, (B, in_planes, D2, H2, W2), dtype=jnp.float32)
    out2 = jax.block_until_ready(
        attention3d_forward(x2, w1, w2, temperature, max_block_bytes=8 << 10))
    ref2 = attention3d_reference(x2, w1, w2, temperature)
    assert out2.shape == (B, K)
    assert jnp.allclose(out2, ref2, atol=1e-5, rtol=1e-5), (out2, ref2)
    assert jnp.allclose(jnp.sum(out2, axis=1), 1.0, atol=1e-5)

    print("KERNEL_OK")
</pallas_src>

<mosaic_0001>
module attributes {stable_mosaic.version = 11 : i64} {
  func.func @_pooled_sum_kernel(%arg0: i32, %arg1: i32, %arg2: memref<8x512xf32, #tpu.memory_space<vmem>>, %arg3: memref<1x8x1xf32, #tpu.memory_space<vmem>>) attributes {dimension_semantics = [#tpu.dimension_semantics<parallel>, #tpu.dimension_semantics<arbitrary>], iteration_bounds = array<i64: 1, 1>, scalar_prefetch = 0 : i64, scratch_operands = 0 : i64, tpu.core_type = #tpu.core_type<tc>, window_params = [{transform_indices = @transform_0, window_bounds = array<i64: 8, 512>}, {transform_indices = @transform_1, window_bounds = array<i64: 1, 8, 1>}]} {
    %c0_i32 = arith.constant 0 : i32
    %0 = arith.cmpi eq, %arg1, %c0_i32 : i32
    %1 = arith.extui %0 : i1 to i32
    %c0_i32_0 = arith.constant 0 : i32
    %2 = arith.cmpi ne, %1, %c0_i32_0 : i32
    scf.if %2 {
      %cst_8 = arith.constant 0.000000e+00 : f32
      %10 = vector.broadcast %cst_8 : f32 to vector<1x8x1xf32>
      %c0_9 = arith.constant 0 : index
      %c0_10 = arith.constant 0 : index
      %c0_11 = arith.constant 0 : index
      %11 = vector.load %arg3[%c0_9, %c0_10, %c0_11] : memref<1x8x1xf32, #tpu.memory_space<vmem>>, vector<1x8x1xf32>
      tpu.vector_store %arg3[%c0_9, %c0_10, %c0_11], %10 {strides = array<i32>} : memref<1x8x1xf32, #tpu.memory_space<vmem>>, vector<1x8x1xf32>,
    } else {
    }
    %c0 = arith.constant 0 : index
    %c0_1 = arith.constant 0 : index
    %3 = vector.load %arg2[%c0, %c0_1] : memref<8x512xf32, #tpu.memory_space<vmem>>, vector<8x512xf32>
    %c0_2 = arith.constant 0 : index
    %c0_3 = arith.constant 0 : index
    %c0_4 = arith.constant 0 : index
    %4 = vector.load %arg3[%c0_2, %c0_3, %c0_4] : memref<1x8x1xf32, #tpu.memory_space<vmem>>, vector<1x8x1xf32>
    %cst = arith.constant dense<0.000000e+00> : vector<8xf32>
    %5 = vector.multi_reduction <add>, %3, %cst [1] : vector<8x512xf32> to vector<8xf32>
    %6 = vector.shape_cast %5 : vector<8xf32> to vector<8x1xf32>
    %7 = vector.shape_cast %6 : vector<8x1xf32> to vector<1x8x1xf32>
    %8 = arith.addf %4, %7 : vector<1x8x1xf32>
    %c0_5 = arith.constant 0 : index
    %c0_6 = arith.constant 0 : index
    %c0_7 = arith.constant 0 : index
    %9 = vector.load %arg3[%c0_5, %c0_6, %c0_7] : memref<1x8x1xf32, #tpu.memory_space<vmem>>, vector<1x8x1xf32>
    tpu.vector_store %arg3[%c0_5, %c0_6, %c0_7], %8 {strides = array<i32>} : memref<1x8x1xf32, #tpu.memory_space<vmem>>, vector<1x8x1xf32>,
    return
  }
  func.func @transform_0(%arg0: i32, %arg1: i32) -> (i32, i32) {
    %c1_i32 = arith.constant 1 : i32
    %0 = arith.muli %arg0, %c1_i32 : i32
    %1 = arith.addi %0, %arg1 : i32
    %c0_i32 = arith.constant 0 : i32
    %c0_i32_0 = arith.constant 0 : i32
    return %c0_i32, %1 : i32, i32
  }
  func.func @transform_1(%arg0: i32, %arg1: i32) -> (i32, i32, i32) {
    %c0_i32 = arith.constant 0 : i32
    %c0_i32_0 = arith.constant 0 : i32
    %c0_i32_1 = arith.constant 0 : i32
    return %arg0, %c0_i32, %c0_i32_0 : i32, i32, i32
  }
}

</mosaic_0001>

<bundles_post_ra>
// kernel: tpu_custom_call.1
= control target key start
LH: loop header
LB: loop body
LE: loop exit
PB: predicated region body
PF: predicated region fallthrough
CT: control target
= control target key end

     0   :  { %6 = vsyncpa [#allocation3], 0  ;;  %s74_s6 = smov [#allocation2]   ;;  %s98_s0 = inlined_call_operand.hbm [shape: f32[8,512], index: 0, kind: input, shape index: {}]   ;;  %s99_s1 = inlined_call_operand.vmem [shape: f32[1,8,1], index: 1, kind: output, shape index: {}]  }
   0x1   :  { %s17_s7 = sshll.u32 %s74_s6, 4  ;;  %s18_s7 = int_to_ptr.vmem [resolvable:$true] %s17_s7 }
   0x2   :  { %s60_s8 = scalar_lea.vmem %s18_s7, 512  ;;  %p65_p1 = scmp.lt.s32.totalorder %s18_s7, %s18_s7 }
   0x3   :  { %p61_p0 = scmp.ne.s32.totalorder %s18_s7, %s60_s8  ;;  %p66_p2 = scmp.lt.s32.totalorder %s60_s8, %s60_s8 }
   0x5   :  { %p67_p3 = por %p66_p2, %p65_p1 }
   0x7   :  { %p68_p4 = pnand %p67_p3, %p61_p0 }
   0x9   :  { %71 = shalt.err (!%p68_p4)
}
   0xa   :  { %20 = dma.hbm_to_vmem [thread:$0]  %s98_s0, 512, %s18_s7, [#allocation3]  }
   0xb   :  { %72 = dma.done.wait [#allocation3], 512  }
   0xc   :  { %73 = vsyncadd [#allocation3], 4294966784  ;;  %vm30_vm0 = vcmask 7168   ;;  %v75_v0 = vmov 0.0   ;;  %v32_v1 = vld [vmem:[#allocation2] sm:$0xff]  ;;  %v33_v2 = vld [vmem:[#allocation2 + $0x8] sm:$0xff] }
   0xd   :  { %31 = vst.msk [vmem:[%s99_s1] sm:$0xff] %vm30_vm0, %v75_v0  ;;  %v34_v3 = vld [vmem:[#allocation2 + $0x10] sm:$0xff]  ;;  %v37_v4 = vadd.f32 %v33_v2, %v32_v1  ;;  %v35_v5 = vld [vmem:[#allocation2 + $0x18] sm:$0xff] }
   0xf   :  { %v38_v6 = vadd.f32 %v37_v4, %v34_v3 }
  0x11   :  { %v39_v7 = vadd.f32 %v38_v6, %v35_v5 }
  0x13   :  { %40 = vadd.xlane.f32.xlu0 %v39_v7 }
  0x14   :  { %v36_v8 = vld [vmem:[%s99_s1] sm:$0xff] }
  0x9c   :  { %v41_v9 = vpop.xlane.xlu0 %40 }
  0x9d   :  { %v42_v10 = vadd.f32 %v41_v9, %v36_v8 }
  0x9f   :  { %44 = vst.msk [vmem:[%s99_s1] sm:$0xff] %vm30_vm0, %v42_v10 }
  0xa0   :  { %49 = vsyncpa [#allocation3], 1 }

</bundles_post_ra>
